<compile_context>
chip_gen: v7x
topology: tpu7x:2x2x1
jax: 0.10.0
libtpu: 0.0.40
codegen_flags: <defaults>
</compile_context>

<pallas_src>
import functools

import jax
import jax.numpy as jnp
from jax.experimental import pallas as pl
from jax.experimental.pallas import tpu as pltpu

_LANE = 128    # TPU lane width
_SUB = 8       # TPU sublane width
_MAX_TB = 1024  # batch-tile cap: safe against v7x 32 MiB scoped VMEM


def _round_up(x, m):
    return ((x + m - 1) // m) * m


# ----------------------------------------------------------------------------
# Kernel
# ----------------------------------------------------------------------------
def _vae_kernel(layout, x_ref, w_ref, b_ref, out_ref):
    XW, HID, LAT, OUT = layout["XW"], layout["HID"], layout["LAT"], layout["OUT"]
    row = layout["row"]

    x = x_ref[...]                       # (TB, XW) f32: [noise | obs | act | pad]
    xb = x.astype(jnp.bfloat16)

    def dot(a_bf16, w):                  # bf16 x bf16 -> f32 accumulate on MXU
        return jnp.dot(a_bf16, w, preferred_element_type=jnp.float32)

    # ---- fused e1 | d1(obs) : one (XW, 2*HID) matmul on x ----
    fused = dot(xb, w_ref[row["x"]:row["x"] + XW, 0:2 * HID]) + b_ref[0:1, 0:2 * HID]
    h = jnp.maximum(fused[:, 0:HID], 0.0)          # encoder layer-1 activation
    d1_part = fused[:, HID:2 * HID]                # d1 obs partial (+ d1 bias)

    # ---- encoder layer 2 ----
    h = dot(h.astype(jnp.bfloat16),
            w_ref[row["e2d2"]:row["e2d2"] + HID, 0:HID]) + b_ref[1:2, 0:HID]
    h = jnp.maximum(h, 0.0)

    # ---- fused mean | log_std head ----
    head = dot(h.astype(jnp.bfloat16),
               w_ref[row["head"]:row["head"] + HID, 0:2 * LAT]) + b_ref[2:3, 0:2 * LAT]
    mean = head[:, 0:LAT]
    log_std = jnp.clip(head[:, LAT:2 * LAT], -4.0, 15.0)
    std = jnp.exp(log_std)

    # reparameterization: noise sits in x lanes [0:latent_dim).  Lanes beyond
    # latent_dim hold obs/act values (garbage) — harmless because the matching
    # d1z weight rows are zero.
    z = mean + std * x[:, 0:LAT]

    # ---- decoder ----
    a = jnp.maximum(
        d1_part + dot(z.astype(jnp.bfloat16),
                      w_ref[row["d1zd3"]:row["d1zd3"] + LAT, 0:HID]), 0.0)
    a = jnp.maximum(
        dot(a.astype(jnp.bfloat16),
            w_ref[row["e2d2"]:row["e2d2"] + HID, HID:2 * HID])
        + b_ref[1:2, HID:2 * HID], 0.0)
    pre = dot(a.astype(jnp.bfloat16),
              w_ref[row["d1zd3"]:row["d1zd3"] + HID, HID:HID + OUT]) + b_ref[3:4, 0:OUT]
    u = b_ref[4:5, 0:OUT] * jnp.tanh(pre)          # max_action scale row (data)

    # fused lane-dense output slab: u | mean | std
    out_ref[:, 0:OUT] = u
    out_ref[:, OUT:OUT + LAT] = mean
    out_ref[:, OUT + LAT:OUT + 2 * LAT] = std


# ----------------------------------------------------------------------------
# Parameter packing (done once, outside the forward)
# ----------------------------------------------------------------------------
def pack_vae_params(params, obs_dim, act_dim, hidden_dim, latent_dim, out_dim,
                    max_action):
    """Pack all weights into one lane-padded bf16 slab + a small f32 bias slab."""
    HID = _round_up(hidden_dim, _LANE)
    LAT = _round_up(latent_dim, _LANE)
    OUT = _round_up(out_dim, _LANE)
    XW = _round_up(latent_dim + obs_dim + act_dim, _LANE)   # x slab lane width
    W = max(2 * HID, 2 * LAT, HID + OUT)                    # slab lane width

    row = {"x": 0, "e2d2": XW, "head": XW + HID, "d1zd3": XW + 2 * HID}
    Rw = XW + 2 * HID + max(LAT, HID)

    w = jnp.zeros((Rw, W), jnp.float32)
    # fused e1 | d1(obs) block; x lane layout is [noise | obs | act | pad],
    # so the obs/act weight rows are shifted by latent_dim and the noise rows
    # stay zero.
    ro = row["x"] + latent_dim                 # obs rows start
    ra = ro + obs_dim                          # act rows start
    w = w.at[ro:ro + obs_dim, 0:hidden_dim].set(params["e1w_obs"])
    w = w.at[ra:ra + act_dim, 0:hidden_dim].set(params["e1w_act"])
    w = w.at[ro:ro + obs_dim, HID:HID + hidden_dim].set(params["d1w_obs"])
    # e2 | d2 block
    w = w.at[row["e2d2"]:row["e2d2"] + hidden_dim, 0:hidden_dim].set(params["e2w"])
    w = w.at[row["e2d2"]:row["e2d2"] + hidden_dim, HID:HID + hidden_dim].set(params["d2w"])
    # fused mean | log_std head
    w = w.at[row["head"]:row["head"] + hidden_dim, 0:latent_dim].set(params["mw"])
    w = w.at[row["head"]:row["head"] + hidden_dim, LAT:LAT + latent_dim].set(params["lw"])
    # d1z | d3 block
    w = w.at[row["d1zd3"]:row["d1zd3"] + latent_dim, 0:hidden_dim].set(params["d1w_z"])
    w = w.at[row["d1zd3"]:row["d1zd3"] + hidden_dim, HID:HID + out_dim].set(params["d3w"])
    w_slab = w.astype(jnp.bfloat16)

    # bias / scale slab stays f32 (added after the f32-accumulated dots)
    b = jnp.zeros((_SUB, W), jnp.float32)
    b = b.at[0, 0:hidden_dim].set(params["e1b"][0])
    b = b.at[0, HID:HID + hidden_dim].set(params["d1b"][0])
    b = b.at[1, 0:hidden_dim].set(params["e2b"][0])
    b = b.at[1, HID:HID + hidden_dim].set(params["d2b"][0])
    b = b.at[2, 0:latent_dim].set(params["mb"][0])
    b = b.at[2, LAT:LAT + latent_dim].set(params["lb"][0])
    b = b.at[3, 0:out_dim].set(params["d3b"][0])
    b = b.at[4, 0:OUT].set(jnp.full((OUT,), float(max_action), jnp.float32))

    layout = dict(XW=XW, HID=HID, LAT=LAT, OUT=OUT, row=row,
                  obs_dim=obs_dim, act_dim=act_dim, hidden_dim=hidden_dim,
                  latent_dim=latent_dim, out_dim=out_dim)
    return w_slab, b, layout


# ----------------------------------------------------------------------------
# Forward wrapper
# ----------------------------------------------------------------------------
def vae_forward(w_slab, b_slab, layout, obs, action, noise):
    """Pallas implementation of VAE.forward. Returns (u, mean, std)."""
    B = obs.shape[0]
    XW, LAT, OUT = layout["XW"], layout["LAT"], layout["OUT"]
    latent_dim = layout["latent_dim"]
    out_dim = layout["out_dim"]
    OUTW = OUT + 2 * LAT

    # batch tiling: >= 2 tiles whenever B is non-trivial so the "parallel"
    # batch axis shards across both TensorCores on v7x; cap keeps VMEM safe.
    TB = min(_round_up(max((B + 1) // 2, 1), _SUB), _MAX_TB)
    Bp = _round_up(B, TB)
    nb = Bp // TB

    # one lane-padded input slab: [noise | obs | act | zero-pad]  (128 lanes)
    x = jnp.concatenate([noise, obs, action], axis=1).astype(jnp.float32)
    x = jnp.pad(x, ((0, Bp - B), (0, XW - x.shape[1])))

    Rw, Ww = w_slab.shape
    kernel = functools.partial(_vae_kernel, layout)

    out = pl.pallas_call(
        kernel,
        out_shape=jax.ShapeDtypeStruct((Bp, OUTW), jnp.float32),
        grid=(nb,),
        in_specs=[
            pl.BlockSpec((TB, XW), lambda i: (i, 0)),
            # constant block index -> parameter slabs stay VMEM-resident
            pl.BlockSpec((Rw, Ww), lambda i: (0, 0)),
            pl.BlockSpec((_SUB, Ww), lambda i: (0, 0)),
        ],
        out_specs=pl.BlockSpec((TB, OUTW), lambda i: (i, 0)),
        compiler_params=pltpu.CompilerParams(
            dimension_semantics=("parallel",)),
    )(x, w_slab, b_slab)

    # strip lane/batch padding and split the fused output slab
    u = out[:B, 0:out_dim]
    mean = out[:B, OUT:OUT + latent_dim]
    std = out[:B, OUT + LAT:OUT + LAT + latent_dim]
    return u, mean, std


# ----------------------------------------------------------------------------
# Parameter init (unpadded, torch nn.Linear-style, weights pre-transposed)
# ----------------------------------------------------------------------------
def init_vae_params(key, input_dim, output_dim, hidden_dim, latent_dim):
    def linear(k, fan_in, fan_out):
        kw, kb = jax.random.split(k)
        bound = 1.0 / jnp.sqrt(fan_in)
        w = jax.random.uniform(kw, (fan_in, fan_out), jnp.float32, -bound, bound)
        b = jax.random.uniform(kb, (1, fan_out), jnp.float32, -bound, bound)
        return w, b

    keys = jax.random.split(key, 7)
    e1w, e1b = linear(keys[0], input_dim + output_dim, hidden_dim)
    e2w, e2b = linear(keys[1], hidden_dim, hidden_dim)
    mw, mb = linear(keys[2], hidden_dim, latent_dim)
    lw, lb = linear(keys[3], hidden_dim, latent_dim)
    d1w, d1b = linear(keys[4], input_dim + latent_dim, hidden_dim)
    d2w, d2b = linear(keys[5], hidden_dim, hidden_dim)
    d3w, d3b = linear(keys[6], hidden_dim, output_dim)

    return {
        "e1w_obs": e1w[:input_dim], "e1w_act": e1w[input_dim:], "e1b": e1b,
        "e2w": e2w, "e2b": e2b,
        "mw": mw, "mb": mb,
        "lw": lw, "lb": lb,
        "d1w_obs": d1w[:input_dim], "d1w_z": d1w[input_dim:], "d1b": d1b,
        "d2w": d2w, "d2b": d2b,
        "d3w": d3w, "d3b": d3b,
    }


def vae_forward_ref(params, obs, action, noise, max_action,
                    matmul_dtype=jnp.float32):
    """Pure-JAX reference (optionally with bf16 matmul operands, f32 accumulate)."""
    def mm(a, w):
        return jnp.dot(a.astype(matmul_dtype), w.astype(matmul_dtype),
                       preferred_element_type=jnp.float32)

    x = jnp.concatenate([obs, action], axis=1)
    e1w = jnp.concatenate([params["e1w_obs"], params["e1w_act"]], axis=0)
    h = jax.nn.relu(mm(x, e1w) + params["e1b"])
    h = jax.nn.relu(mm(h, params["e2w"]) + params["e2b"])
    mean = mm(h, params["mw"]) + params["mb"]
    log_std = jnp.clip(mm(h, params["lw"]) + params["lb"], -4.0, 15.0)
    std = jnp.exp(log_std)
    z = mean + std * noise
    d1w = jnp.concatenate([params["d1w_obs"], params["d1w_z"]], axis=0)
    a = jax.nn.relu(mm(jnp.concatenate([obs, z], axis=1), d1w) + params["d1b"])
    a = jax.nn.relu(mm(a, params["d2w"]) + params["d2b"])
    u = max_action * jnp.tanh(mm(a, params["d3w"]) + params["d3b"])
    return u, mean, std


if __name__ == "__main__":
    # small, forward-consistent shapes
    batch = 8
    input_dim = 11      # obs dim
    output_dim = 3      # action dim
    hidden_dim = 32
    latent_dim = 6
    max_action = 1.0

    key = jax.random.PRNGKey(0)
    k_params, k_obs, k_act, k_noise = jax.random.split(key, 4)

    params = init_vae_params(k_params, input_dim, output_dim, hidden_dim, latent_dim)
    obs = jax.random.normal(k_obs, (batch, input_dim), jnp.float32)
    action = jax.random.normal(k_act, (batch, output_dim), jnp.float32)
    # torch.randn_like(std) -> pre-sampled standard-normal noise passed in
    noise = jax.random.normal(k_noise, (batch, latent_dim), jnp.float32)

    w_slab, b_slab, layout = pack_vae_params(
        params, input_dim, output_dim, hidden_dim, latent_dim, output_dim,
        max_action)

    u, mean, std = vae_forward(w_slab, b_slab, layout, obs, action, noise)
    jax.block_until_ready((u, mean, std))

    # exact-structure check vs a bf16-matmul reference (same rounding path)
    u16, m16, s16 = vae_forward_ref(params, obs, action, noise, max_action,
                                    matmul_dtype=jnp.bfloat16)
    assert jnp.allclose(u, u16, atol=1e-2, rtol=1e-2), "u mismatch (bf16 ref)"
    assert jnp.allclose(mean, m16, atol=1e-2, rtol=1e-2), "mean mismatch (bf16 ref)"
    assert jnp.allclose(std, s16, atol=1e-2, rtol=1e-2), "std mismatch (bf16 ref)"

    # semantic check vs the full-f32 torch-equivalent reference
    u32, m32, s32 = vae_forward_ref(params, obs, action, noise, max_action)
    assert jnp.allclose(u, u32, atol=5e-2, rtol=5e-2), "u mismatch (f32 ref)"
    assert jnp.allclose(mean, m32, atol=5e-2, rtol=5e-2), "mean mismatch (f32 ref)"
    assert jnp.allclose(std, s32, atol=5e-2, rtol=5e-2), "std mismatch (f32 ref)"

    print("KERNEL_OK")
</pallas_src>

<mosaic_0001>
module attributes {stable_mosaic.version = 11 : i64} {
  func.func @_vae_kernel(%arg0: i32, %arg1: memref<8x128xf32, #tpu.memory_space<vmem>>, %arg2: memref<512x256xbf16, #tpu.memory_space<vmem>>, %arg3: memref<8x256xf32, #tpu.memory_space<vmem>>, %arg4: memref<8x384xf32, #tpu.memory_space<vmem>>) attributes {dimension_semantics = [#tpu.dimension_semantics<parallel>], iteration_bounds = array<i64: 1>, scalar_prefetch = 0 : i64, scratch_operands = 0 : i64, tpu.core_type = #tpu.core_type<tc>, window_params = [{transform_indices = @transform_0, window_bounds = array<i64: 8, 128>}, {pipeline_mode = #tpu.pipeline_mode<synchronous>, transform_indices = @transform_1, window_bounds = array<i64: 512, 256>}, {pipeline_mode = #tpu.pipeline_mode<synchronous>, transform_indices = @transform_2, window_bounds = array<i64: 8, 256>}, {transform_indices = @transform_3, window_bounds = array<i64: 8, 384>}]} {
    %c0 = arith.constant 0 : index
    %c0_0 = arith.constant 0 : index
    %0 = vector.load %arg1[%c0, %c0_0] : memref<8x128xf32, #tpu.memory_space<vmem>>, vector<8x128xf32>
    %1 = arith.truncf %0 : vector<8x128xf32> to vector<8x128xbf16>
    %c0_1 = arith.constant 0 : index
    %c0_2 = arith.constant 0 : index
    %2 = vector.load %arg2[%c0_1, %c0_2] : memref<512x256xbf16, #tpu.memory_space<vmem>>, vector<128x256xbf16>
    %cst = arith.constant dense<0.000000e+00> : vector<8x256xf32>
    %3 = tpu.matmul %1, %2, %cst {dimension_numbers = #tpu.dot_dimension_numbers<[1], [0], [0], [1], [0, 0, 1, 1], [], []>} : vector<8x128xbf16>, vector<128x256xbf16>, vector<8x256xf32> -> vector<8x256xf32>
    %c0_3 = arith.constant 0 : index
    %c0_4 = arith.constant 0 : index
    %4 = vector.load %arg3[%c0_3, %c0_4] : memref<8x256xf32, #tpu.memory_space<vmem>>, vector<1x256xf32>
    %5 = vector.broadcast %4 : vector<1x256xf32> to vector<8x256xf32>
    %6 = arith.addf %3, %5 : vector<8x256xf32>
    %7 = vector.extract_strided_slice %6 {offsets = [0, 0], sizes = [8, 128], strides = [1, 1]} : vector<8x256xf32> to vector<8x128xf32>
    %cst_5 = arith.constant 0.000000e+00 : f32
    %8 = vector.broadcast %cst_5 : f32 to vector<8x128xf32>
    %9 = arith.maximumf %7, %8 : vector<8x128xf32>
    %10 = vector.extract_strided_slice %6 {offsets = [0, 128], sizes = [8, 128], strides = [1, 1]} : vector<8x256xf32> to vector<8x128xf32>
    %11 = arith.truncf %9 : vector<8x128xf32> to vector<8x128xbf16>
    %c128 = arith.constant 128 : index
    %c0_6 = arith.constant 0 : index
    %12 = vector.load %arg2[%c128, %c0_6] : memref<512x256xbf16, #tpu.memory_space<vmem>>, vector<128x128xbf16>
    %cst_7 = arith.constant dense<0.000000e+00> : vector<8x128xf32>
    %13 = tpu.matmul %11, %12, %cst_7 {dimension_numbers = #tpu.dot_dimension_numbers<[1], [0], [0], [1], [0, 0, 1, 1], [], []>} : vector<8x128xbf16>, vector<128x128xbf16>, vector<8x128xf32> -> vector<8x128xf32>
    %c1 = arith.constant 1 : index
    %c0_8 = arith.constant 0 : index
    %14 = vector.load %arg3[%c1, %c0_8] : memref<8x256xf32, #tpu.memory_space<vmem>>, vector<1x128xf32>
    %15 = vector.broadcast %14 : vector<1x128xf32> to vector<8x128xf32>
    %16 = arith.addf %13, %15 : vector<8x128xf32>
    %cst_9 = arith.constant 0.000000e+00 : f32
    %17 = vector.broadcast %cst_9 : f32 to vector<8x128xf32>
    %18 = arith.maximumf %16, %17 : vector<8x128xf32>
    %19 = arith.truncf %18 : vector<8x128xf32> to vector<8x128xbf16>
    %c256 = arith.constant 256 : index
    %c0_10 = arith.constant 0 : index
    %20 = vector.load %arg2[%c256, %c0_10] : memref<512x256xbf16, #tpu.memory_space<vmem>>, vector<128x256xbf16>
    %cst_11 = arith.constant dense<0.000000e+00> : vector<8x256xf32>
    %21 = tpu.matmul %19, %20, %cst_11 {dimension_numbers = #tpu.dot_dimension_numbers<[1], [0], [0], [1], [0, 0, 1, 1], [], []>} : vector<8x128xbf16>, vector<128x256xbf16>, vector<8x256xf32> -> vector<8x256xf32>
    %c2 = arith.constant 2 : index
    %c0_12 = arith.constant 0 : index
    %22 = vector.load %arg3[%c2, %c0_12] : memref<8x256xf32, #tpu.memory_space<vmem>>, vector<1x256xf32>
    %23 = vector.broadcast %22 : vector<1x256xf32> to vector<8x256xf32>
    %24 = arith.addf %21, %23 : vector<8x256xf32>
    %25 = vector.extract_strided_slice %24 {offsets = [0, 0], sizes = [8, 128], strides = [1, 1]} : vector<8x256xf32> to vector<8x128xf32>
    %26 = vector.extract_strided_slice %24 {offsets = [0, 128], sizes = [8, 128], strides = [1, 1]} : vector<8x256xf32> to vector<8x128xf32>
    %cst_13 = arith.constant -4.000000e+00 : f32
    %cst_14 = arith.constant 1.500000e+01 : f32
    %27 = vector.broadcast %cst_13 : f32 to vector<8x128xf32>
    %28 = arith.maximumf %27, %26 : vector<8x128xf32>
    %29 = vector.broadcast %cst_14 : f32 to vector<8x128xf32>
    %30 = arith.minimumf %29, %28 : vector<8x128xf32>
    %31 = math.exp %30 : vector<8x128xf32>
    %32 = arith.mulf %31, %0 : vector<8x128xf32>
    %33 = arith.addf %25, %32 : vector<8x128xf32>
    %34 = arith.truncf %33 : vector<8x128xf32> to vector<8x128xbf16>
    %c384 = arith.constant 384 : index
    %c0_15 = arith.constant 0 : index
    %35 = vector.load %arg2[%c384, %c0_15] : memref<512x256xbf16, #tpu.memory_space<vmem>>, vector<128x128xbf16>
    %cst_16 = arith.constant dense<0.000000e+00> : vector<8x128xf32>
    %36 = tpu.matmul %34, %35, %cst_16 {dimension_numbers = #tpu.dot_dimension_numbers<[1], [0], [0], [1], [0, 0, 1, 1], [], []>} : vector<8x128xbf16>, vector<128x128xbf16>, vector<8x128xf32> -> vector<8x128xf32>
    %37 = arith.addf %10, %36 : vector<8x128xf32>
    %cst_17 = arith.constant 0.000000e+00 : f32
    %38 = vector.broadcast %cst_17 : f32 to vector<8x128xf32>
    %39 = arith.maximumf %37, %38 : vector<8x128xf32>
    %40 = arith.truncf %39 : vector<8x128xf32> to vector<8x128xbf16>
    %c128_18 = arith.constant 128 : index
    %c128_19 = arith.constant 128 : index
    %41 = vector.load %arg2[%c128_18, %c128_19] : memref<512x256xbf16, #tpu.memory_space<vmem>>, vector<128x128xbf16>
    %cst_20 = arith.constant dense<0.000000e+00> : vector<8x128xf32>
    %42 = tpu.matmul %40, %41, %cst_20 {dimension_numbers = #tpu.dot_dimension_numbers<[1], [0], [0], [1], [0, 0, 1, 1], [], []>} : vector<8x128xbf16>, vector<128x128xbf16>, vector<8x128xf32> -> vector<8x128xf32>
    %c1_21 = arith.constant 1 : index
    %c128_22 = arith.constant 128 : index
    %43 = vector.load %arg3[%c1_21, %c128_22] : memref<8x256xf32, #tpu.memory_space<vmem>>, vector<1x128xf32>
    %44 = vector.broadcast %43 : vector<1x128xf32> to vector<8x128xf32>
    %45 = arith.addf %42, %44 : vector<8x128xf32>
    %cst_23 = arith.constant 0.000000e+00 : f32
    %46 = vector.broadcast %cst_23 : f32 to vector<8x128xf32>
    %47 = arith.maximumf %45, %46 : vector<8x128xf32>
    %48 = arith.truncf %47 : vector<8x128xf32> to vector<8x128xbf16>
    %c384_24 = arith.constant 384 : index
    %c128_25 = arith.constant 128 : index
    %49 = vector.load %arg2[%c384_24, %c128_25] : memref<512x256xbf16, #tpu.memory_space<vmem>>, vector<128x128xbf16>
    %cst_26 = arith.constant dense<0.000000e+00> : vector<8x128xf32>
    %50 = tpu.matmul %48, %49, %cst_26 {dimension_numbers = #tpu.dot_dimension_numbers<[1], [0], [0], [1], [0, 0, 1, 1], [], []>} : vector<8x128xbf16>, vector<128x128xbf16>, vector<8x128xf32> -> vector<8x128xf32>
    %c3 = arith.constant 3 : index
    %c0_27 = arith.constant 0 : index
    %51 = vector.load %arg3[%c3, %c0_27] : memref<8x256xf32, #tpu.memory_space<vmem>>, vector<1x128xf32>
    %52 = vector.broadcast %51 : vector<1x128xf32> to vector<8x128xf32>
    %53 = arith.addf %50, %52 : vector<8x128xf32>
    %c4 = arith.constant 4 : index
    %c0_28 = arith.constant 0 : index
    %54 = vector.load %arg3[%c4, %c0_28] : memref<8x256xf32, #tpu.memory_space<vmem>>, vector<1x128xf32>
    %55 = math.tanh %53 : vector<8x128xf32>
    %56 = vector.broadcast %54 : vector<1x128xf32> to vector<8x128xf32>
    %57 = arith.mulf %56, %55 : vector<8x128xf32>
    %c0_29 = arith.constant 0 : index
    %c0_30 = arith.constant 0 : index
    %58 = vector.load %arg4[%c0_29, %c0_30] : memref<8x384xf32, #tpu.memory_space<vmem>>, vector<8x128xf32>
    tpu.vector_store %arg4[%c0_29, %c0_30], %57 {strides = array<i32>} : memref<8x384xf32, #tpu.memory_space<vmem>>, vector<8x128xf32>,
    %c0_31 = arith.constant 0 : index
    %c128_32 = arith.constant 128 : index
    %59 = vector.load %arg4[%c0_31, %c128_32] : memref<8x384xf32, #tpu.memory_space<vmem>>, vector<8x128xf32>
    tpu.vector_store %arg4[%c0_31, %c128_32], %25 {strides = array<i32>} : memref<8x384xf32, #tpu.memory_space<vmem>>, vector<8x128xf32>,
    %c0_33 = arith.constant 0 : index
    %c256_34 = arith.constant 256 : index
    %60 = vector.load %arg4[%c0_33, %c256_34] : memref<8x384xf32, #tpu.memory_space<vmem>>, vector<8x128xf32>
    tpu.vector_store %arg4[%c0_33, %c256_34], %31 {strides = array<i32>} : memref<8x384xf32, #tpu.memory_space<vmem>>, vector<8x128xf32>,
    return
  }
  func.func @transform_0(%arg0: i32) -> (i32, i32) {
    %c0_i32 = arith.constant 0 : i32
    %c0_i32_0 = arith.constant 0 : i32
    return %arg0, %c0_i32 : i32, i32
  }
  func.func @transform_1(%arg0: i32) -> (i32, i32) {
    %c0_i32 = arith.constant 0 : i32
    %c0_i32_0 = arith.constant 0 : i32
    %c0_i32_1 = arith.constant 0 : i32
    return %c0_i32, %c0_i32_0 : i32, i32
  }
  func.func @transform_2(%arg0: i32) -> (i32, i32) {
    %c0_i32 = arith.constant 0 : i32
    %c0_i32_0 = arith.constant 0 : i32
    %c0_i32_1 = arith.constant 0 : i32
    return %c0_i32, %c0_i32_0 : i32, i32
  }
  func.func @transform_3(%arg0: i32) -> (i32, i32) {
    %c0_i32 = arith.constant 0 : i32
    %c0_i32_0 = arith.constant 0 : i32
    return %arg0, %c0_i32 : i32, i32
  }
}

</mosaic_0001>

<bundles_post_ra>
// kernel: tpu_custom_call.1
= control target key start
LH: loop header
LB: loop body
LE: loop exit
PB: predicated region body
PF: predicated region fallthrough
CT: control target
= control target key end

     0   :  { %8 = vsyncpa [#allocation3], 0  ;;  %s1315_s0 = inlined_call_operand.hbm [shape: f32[8,128], index: 0, kind: input, shape index: {}]   ;;  %s1316_s1 = inlined_call_operand.hbm [shape: bf16[512,256], index: 1, kind: input, shape index: {}]   ;;  %s1317_s2 = inlined_call_operand.hbm [shape: f32[8,256], index: 2, kind: input, shape index: {}]   ;;  %s1318_s3 = inlined_call_operand.hbm [shape: f32[8,384], index: 3, kind: output, shape index: {}]  }
   0x1   :  { %9 = vsyncpa [#allocation6], 0 }
   0x2   :  { %10 = vsyncpa [#allocation4], 0  ;;  %s1178_s12 = smov [#allocation5]   ;;  %s1084_s16 = scalar_lea.hbm %s1316_s1, 8192 }
   0x3   :  { %s26_s13 = sshll.u32 %s1178_s12, 4  ;;  %p1085_p0 = scmp.ne.s32.totalorder %s1316_s1, %s1084_s16  ;;  %s27_s13 = int_to_ptr.vmem [resolvable:$true] %s26_s13 }
   0x4   :  { %p1088_p1 = scmp.lt.u32.totalorder %s1084_s16, %s1316_s1 }
   0x6   :  { %p1090_p2 = pnand %p1088_p1, %p1085_p0 }
   0x8   :  { %1093 = shalt.err (!%p1090_p2)
}
   0x9   :  { %s1094_s21 = scalar_lea.vmem %s27_s13, 8192  ;;  %p1099_p4 = scmp.lt.s32.totalorder %s27_s13, %s27_s13 }
   0xa   :  { %p1095_p3 = scmp.ne.s32.totalorder %s27_s13, %s1094_s21  ;;  %p1100_p5 = scmp.lt.s32.totalorder %s1094_s21, %s1094_s21 }
   0xc   :  { %p1101_p6 = por %p1100_p5, %p1099_p4 }
   0xe   :  { %p1102_p7 = pnand %p1101_p6, %p1095_p3 }
  0x10   :  { %1105 = shalt.err (!%p1102_p7)
}
  0x11   :  { %s1179_s22 = smov 128   ;;  %s1180_s23 = smov 8  }
  0x12   :  { %32 = dma.hbm_to_vmem [thread:$0]  %s1316_s1, 8192, %s27_s13, [#allocation6], %s1179_s22, %s1179_s22, %s1180_s23  }
  0x13   :  { %s1181_s26 = smov [#allocation2]   ;;  %s1182_s28 = smov [#allocation7]  }
  0x14   :  { %s17_s27 = sshll.u32 %s1181_s26, 4  ;;  %s39_s29 = sshll.u32 %s1182_s28, 4  ;;  %s18_s27 = int_to_ptr.vmem [resolvable:$true] %s17_s27  ;;  %s40_s29 = int_to_ptr.vmem [resolvable:$true] %s39_s29 }
  0x15   :  { %s1106_s5 = scalar_lea.hbm %s1315_s0, 128 }
  0x16   :  { %p1107_p8 = scmp.ne.s32.totalorder %s1315_s0, %s1106_s5  ;;  %p1110_p9 = scmp.lt.u32.totalorder %s1106_s5, %s1315_s0 }
  0x18   :  { %p1112_p10 = pnand %p1110_p9, %p1107_p8 }
  0x1a   :  { %1115 = shalt.err (!%p1112_p10)
}
  0x1b   :  { %s1116_s1 = scalar_lea.vmem %s18_s27, 128  ;;  %p1121_p12 = scmp.lt.s32.totalorder %s18_s27, %s18_s27 }
  0x1c   :  { %p1117_p11 = scmp.ne.s32.totalorder %s18_s27, %s1116_s1  ;;  %p1122_p13 = scmp.lt.s32.totalorder %s1116_s1, %s1116_s1 }
  0x1e   :  { %p1123_p0 = por %p1122_p13, %p1121_p12 }
  0x20   :  { %p1124_p1 = pnand %p1123_p0, %p1117_p11 }
  0x22   :  { %1127 = shalt.err (!%p1124_p1)
}
  0x23   :  { %20 = dma.hbm_to_vmem [thread:$0]  %s1315_s0, 128, %s18_s27, [#allocation3]  }
  0x24   :  { %s1128_s14 = scalar_lea.hbm %s1317_s2, 256 }
  0x25   :  { %p1129_p2 = scmp.ne.s32.totalorder %s1317_s2, %s1128_s14  ;;  %p1132_p3 = scmp.lt.u32.totalorder %s1128_s14, %s1317_s2 }
  0x27   :  { %p1134_p4 = pnand %p1132_p3, %p1129_p2 }
  0x29   :  { %1137 = shalt.err (!%p1134_p4)
}
  0x2a   :  { %s1138_s19 = scalar_lea.vmem %s40_s29, 256  ;;  %p1143_p6 = scmp.lt.s32.totalorder %s40_s29, %s40_s29 }
  0x2b   :  { %p1139_p5 = scmp.ne.s32.totalorder %s40_s29, %s1138_s19  ;;  %p1144_p7 = scmp.lt.s32.totalorder %s1138_s19, %s1138_s19 }
  0x2d   :  { %p1145_p8 = por %p1144_p7, %p1143_p6 }
  0x2f   :  { %p1146_p9 = pnand %p1145_p8, %p1139_p5 }
  0x31   :  { %1149 = shalt.err (!%p1146_p9)
}
  0x32   :  { %42 = dma.hbm_to_vmem [thread:$0]  %s1317_s2, 256, %s40_s29, [#allocation6]  }
  0x33   :  { %1172 = dma.done.wait [#allocation3], 128  }
  0x34   :  { %1173 = vsyncadd [#allocation3], 4294967168 }
  0x35   :  { %1174 = dma.done.wait [#allocation6], 8448  }
  0x36   :  { %1175 = vsyncadd [#allocation6], 4294958848  ;;  %v1183_v0 = vmov 0   ;;  %v1184_v1 = vmov 0.0   ;;  %v1000_v2 = vld [vmem:[#allocation5 + $0x4] ss:$8 sps:$4 sm:$0xff]   ;;  %v73_v42 = vlaneseq }
  0x37   :  { %195 = vmatprep.mubr.bf16.mxu0 %v1183_v0  ;;  %911 = vmatprep.subr.bf16.mxu1 %v1184_v1  ;;  %v1002_v3 = vld [vmem:[#allocation5] ss:$8 sps:$4 sm:$0xff]   ;;  %v1003_v4 = vld [vmem:[#allocation5 + $0x14] ss:$8 sps:$4 sm:$0xff]   ;;  %v1005_v5 = vld [vmem:[#allocation5 + $0x10] ss:$8 sps:$4 sm:$0xff]  }
  0x38   :  { %163 = vmatprep.subr.bf16.mxu0 %v1000_v2  ;;  %v1006_v6 = vld [vmem:[#allocation5 + $0x24] ss:$8 sps:$4 sm:$0xff]   ;;  %v1008_v7 = vld [vmem:[#allocation5 + $0x20] ss:$8 sps:$4 sm:$0xff]   ;;  %v1009_v8 = vld [vmem:[#allocation5 + $0x34] ss:$8 sps:$4 sm:$0xff]  }
  0x39   :  { %164 = vmatpush1.bf16.msra.mxu0 %v1002_v3  ;;  %v1011_v9 = vld [vmem:[#allocation5 + $0x30] ss:$8 sps:$4 sm:$0xff]   ;;  %v1024_v10 = vld [vmem:[#allocation5 + $0x80] ss:$8 sps:$4 sm:$0xff]   ;;  %v1012_v11 = vld [vmem:[#allocation5 + $0x44] ss:$8 sps:$4 sm:$0xff]  }
  0x3a   :  { %165 = vmatprep.subr.bf16.mxu0 %v1003_v4  ;;  %912 = vmatpush3.bf16.msra.mxu1 %v1024_v10  ;;  %v1025_v12 = vld [vmem:[#allocation5 + $0x90] ss:$8 sps:$4 sm:$0xff]   ;;  %v1014_v13 = vld [vmem:[#allocation5 + $0x40] ss:$8 sps:$4 sm:$0xff]   ;;  %v1015_v14 = vld [vmem:[#allocation5 + $0x54] ss:$8 sps:$4 sm:$0xff]  }
  0x3b   :  { %913 = vmatprep.subr.bf16.mxu1 %v1184_v1  ;;  %v1017_v15 = vld [vmem:[#allocation5 + $0x50] ss:$8 sps:$4 sm:$0xff]   ;;  %v1026_v16 = vld [vmem:[#allocation5 + $0xa0] ss:$8 sps:$4 sm:$0xff]   ;;  %v1018_v17 = vld [vmem:[#allocation5 + $0x64] ss:$8 sps:$4 sm:$0xff]  }
  0x3c   :  { %v1027_v18 = vld [vmem:[#allocation5 + $0xb0] ss:$8 sps:$4 sm:$0xff]   ;;  %v1020_v19 = vld [vmem:[#allocation5 + $0x60] ss:$8 sps:$4 sm:$0xff]   ;;  %v1021_v20 = vld [vmem:[#allocation5 + $0x74] ss:$8 sps:$4 sm:$0xff]  }
  0x3d   :  { %166 = vmatpush1.bf16.msra.mxu0 %v1005_v5  ;;  %v1028_v21 = vld [vmem:[#allocation5 + $0xc0] ss:$8 sps:$4 sm:$0xff]   ;;  %v1023_v22 = vld [vmem:[#allocation5 + $0x70] ss:$8 sps:$4 sm:$0xff]   ;;  %vm1185_vm0 = vmmov 0   ;;  %v1258_v43 = vshrl.u32 %v73_v42, 7 }
  0x3e   :  { %167 = vmatprep.subr.bf16.mxu0 %v1006_v6  ;;  %914 = vmatpush3.bf16.msra.mxu1 %v1025_v12  ;;  %v1247_v23 = vld [vmem:[#allocation2] sm:$0xff]  ;;  %v1030_v26 = vld [vmem:[#allocation5 + $0xe0] ss:$8 sps:$4 sm:$0xff]   ;;  %v1034_v29 = vld [vmem:[#allocation5 + $0x104] ss:$8 sps:$4 sm:$0xff]   ;;  %s1186_s2 = smov [#allocation8]  }
  0x3f   :  { %915 = vmatprep.subr.bf16.mxu1 %v1184_v1  ;;  %v1029_v24 = vld [vmem:[#allocation5 + $0xd0] ss:$8 sps:$4 sm:$0xff]   ;;  %v54_v25 = vpack.c.bf16 %v1247_v23, %v1247_v23  ;;  %927 = vmatprep.mubr.msk.bf16.mxu1 %vm1185_vm0, %v1184_v1  ;;  %v1032_v28 = vld [vmem:[#allocation5 + $0x100] ss:$8 sps:$4 sm:$0xff]   ;;  %v1037_v30 = vld [vmem:[#allocation5 + $0x114] ss:$8 sps:$4 sm:$0xff]  }
  0x40   :  { %v1031_v27 = vld [vmem:[#allocation5 + $0xf0] ss:$8 sps:$4 sm:$0xff]   ;;  %v1040_v32 = vld [vmem:[#allocation5 + $0x124] ss:$8 sps:$4 sm:$0xff]   ;;  %v1038_v33 = vld [vmem:[#allocation5 + $0x120] ss:$8 sps:$4 sm:$0xff]  }
  0x41   :  { %168 = vmatpush1.bf16.msra.mxu0 %v1008_v7  ;;  %v1035_v31 = vld [vmem:[#allocation5 + $0x110] ss:$8 sps:$4 sm:$0xff]   ;;  %v1043_v34 = vld [vmem:[#allocation5 + $0x134] ss:$8 sps:$4 sm:$0xff]   ;;  %v1046_v36 = vld [vmem:[#allocation5 + $0x144] ss:$8 sps:$4 sm:$0xff]  }
  0x42   :  { %169 = vmatprep.subr.bf16.mxu0 %v1009_v8  ;;  %916 = vmatpush3.bf16.msra.mxu1 %v1026_v16  ;;  %v1041_v35 = vld [vmem:[#allocation5 + $0x130] ss:$8 sps:$4 sm:$0xff]   ;;  %v1044_v37 = vld [vmem:[#allocation5 + $0x140] ss:$8 sps:$4 sm:$0xff]   ;;  %v1049_v38 = vld [vmem:[#allocation5 + $0x154] ss:$8 sps:$4 sm:$0xff]  }
  0x43   :  { %917 = vmatprep.subr.bf16.mxu1 %v1184_v1  ;;  %v1047_v39 = vld [vmem:[#allocation5 + $0x150] ss:$8 sps:$4 sm:$0xff]   ;;  %v1052_v40 = vld [vmem:[#allocation5 + $0x164] ss:$8 sps:$4 sm:$0xff]   ;;  %v1050_v41 = vld [vmem:[#allocation5 + $0x160] ss:$8 sps:$4 sm:$0xff]  }
  0x44   :  { %v75_v44 = vsub.s32 0, %v1258_v43  ;;  %v1261_v45 = vld [vmem:[#allocation7] ss:$8 sm:$0x3]  ;;  %v1055_v54 = vld [vmem:[#allocation5 + $0x174] ss:$8 sps:$4 sm:$0xff]  }
  0x45   :  { %170 = vmatpush1.bf16.msra.mxu0 %v1011_v9  ;;  %v1053_v55 = vld [vmem:[#allocation5 + $0x170] ss:$8 sps:$4 sm:$0xff]   ;;  %v1056_v56 = vld [vmem:[#allocation5 + $0x180] ss:$8 sps:$4 sm:$0xff]   ;;  %v1064_v9 = vld [vmem:[#allocation5 + $0x84] ss:$8 sps:$4 sm:$0xff]  }
  0x46   :  { %171 = vmatprep.subr.bf16.mxu0 %v1012_v11  ;;  %918 = vmatpush3.bf16.msra.mxu1 %v1027_v18  ;;  %v76_v46 = vrot.slane %v1261_v45, %v75_v44  ;;  %v222_v57 = vld [vmem:[#allocation7 + $0x1] ss:$0 sm:$0xff]  ;;  %v1057_v2 = vld [vmem:[#allocation5 + $0x190] ss:$8 sps:$4 sm:$0xff]   ;;  %v1065_v10 = vld [vmem:[#allocation5 + $0x94] ss:$8 sps:$4 sm:$0xff]  }
  0x47   :  { %919 = vmatprep.subr.bf16.mxu1 %v1184_v1  ;;  %v1058_v3 = vld [vmem:[#allocation5 + $0x1a0] ss:$8 sps:$4 sm:$0xff]   ;;  %v1059_v4 = vld [vmem:[#allocation5 + $0x1b0] ss:$8 sps:$4 sm:$0xff]   ;;  %v1066_v11 = vld [vmem:[#allocation5 + $0xa4] ss:$8 sps:$4 sm:$0xff]  }
  0x48   :  { %v1060_v5 = vld [vmem:[#allocation5 + $0x1c0] ss:$8 sps:$4 sm:$0xff]   ;;  %v1061_v6 = vld [vmem:[#allocation5 + $0x1d0] ss:$8 sps:$4 sm:$0xff]   ;;  %v1067_v12 = vld [vmem:[#allocation5 + $0xb4] ss:$8 sps:$4 sm:$0xff]  }
  0x49   :  { %172 = vmatpush1.bf16.msra.mxu0 %v1014_v13  ;;  %v1062_v7 = vld [vmem:[#allocation5 + $0x1e0] ss:$8 sps:$4 sm:$0xff]   ;;  %v1063_v8 = vld [vmem:[#allocation5 + $0x1f0] ss:$8 sps:$4 sm:$0xff]   ;;  %v1068_v13 = vld [vmem:[#allocation5 + $0xc4] ss:$8 sps:$4 sm:$0xff]  }
  0x4a   :  { %173 = vmatprep.subr.bf16.mxu0 %v1015_v14  ;;  %920 = vmatpush3.bf16.msra.mxu1 %v1028_v21  ;;  %v1069_v14 = vld [vmem:[#allocation5 + $0xd4] ss:$8 sps:$4 sm:$0xff]   ;;  %v79_v16 = vsub.s32 1, %v1258_v43  ;;  %s801_s21 = sshll.u32 %s1186_s2, 4  ;;  %s802_s21 = int_to_ptr.vmem [resolvable:$true] %s801_s21 }
  0x4b   :  { %921 = vmatprep.subr.bf16.mxu1 %v1184_v1  ;;  %s1150_s22 = scalar_lea.vmem %s802_s21, 384  ;;  %p1155_p11 = scmp.lt.s32.totalorder %s802_s21, %s802_s21 }
  0x4c   :  { %p1151_p10 = scmp.ne.s32.totalorder %s802_s21, %s1150_s22  ;;  %p1156_p12 = scmp.lt.s32.totalorder %s1150_s22, %s1150_s22 }
  0x4d   :  { %174 = vmatpush1.bf16.msra.mxu0 %v1017_v15  ;;  %v330_v15 = vld [vmem:[#allocation7 + $0x2] ss:$8 sm:$0x3] }
  0x4e   :  { %175 = vmatprep.subr.bf16.mxu0 %v1018_v17  ;;  %922 = vmatpush3.bf16.msra.mxu1 %v1029_v24  ;;  %v335_v17 = vrot.slane %v330_v15, %v75_v44  ;;  %v339_v18 = vrot.slane %v330_v15, %v79_v16  ;;  %p1157_p13 = por %p1156_p12, %p1155_p11 }
  0x4f   :  { %923 = vmatprep.subr.bf16.mxu1 %v1184_v1 }
  0x50   :  { %p1158_p0 = pnand %p1157_p13, %p1151_p10 }
  0x51   :  { %176 = vmatpush1.bf16.msra.mxu0 %v1020_v19 }
  0x52   :  { %177 = vmatprep.subr.bf16.mxu0 %v1021_v20  ;;  %924 = vmatpush3.bf16.msra.mxu1 %v1030_v26 }
  0x53   :  { %925 = vmatprep.subr.bf16.mxu1 %v1184_v1 }
  0x55   :  { %178 = vmatpush1.bf16.msra.mxu0 %v1023_v22 }
  0x56   :  { %926 = vmatpush3.bf16.msra.mxu1 %v1031_v27  ;;  %422 = vmatprep.subr.bf16.mxu0 %v1034_v29 }
  0x57   :  { %931 = vmatprep.subr.bf16.mxu1 %v1184_v1 }
  0x58   :  { %196 = vmatmul.mubr.bf16.vlgmr.msra.gmra.mrb[0].mxu0 %v54_v25 }
  0x59   :  { %454 = vmatprep.mubr.bf16.mxu0 %v1183_v0  ;;  %423 = vmatpush1.bf16.msra.mxu0 %v1032_v28 }
  0x5a   :  { %424 = vmatprep.subr.bf16.mxu0 %v1037_v30 }
  0x5d   :  { %425 = vmatpush1.bf16.msra.mxu0 %v1035_v31 }
  0x5e   :  { %426 = vmatprep.subr.bf16.mxu0 %v1040_v32 }
  0x61   :  { %427 = vmatpush1.bf16.msra.mxu0 %v1038_v33  ;;  %v1070_v33 = vld [vmem:[#allocation5 + $0xe4] ss:$8 sps:$4 sm:$0xff]  }
  0x62   :  { %428 = vmatprep.subr.bf16.mxu0 %v1043_v34  ;;  %v1071_v34 = vld [vmem:[#allocation5 + $0xf4] ss:$8 sps:$4 sm:$0xff]  }
  0x65   :  { %429 = vmatpush1.bf16.msra.mxu0 %v1041_v35  ;;  %v1072_v35 = vld [vmem:[#allocation5 + $0x184] ss:$8 sps:$4 sm:$0xff]  }
  0x66   :  { %430 = vmatprep.subr.bf16.mxu0 %v1046_v36  ;;  %v1073_v36 = vld [vmem:[#allocation5 + $0x194] ss:$8 sps:$4 sm:$0xff]  }
  0x69   :  { %431 = vmatpush1.bf16.msra.mxu0 %v1044_v37  ;;  %v1074_v37 = vld [vmem:[#allocation5 + $0x1a4] ss:$8 sps:$4 sm:$0xff]  }
  0x6a   :  { %432 = vmatprep.subr.bf16.mxu0 %v1049_v38  ;;  %v1076_v38 = vld [vmem:[#allocation5 + $0x1c4] ss:$8 sps:$4 sm:$0xff]  }
  0x6d   :  { %433 = vmatpush1.bf16.msra.mxu0 %v1047_v39  ;;  %v1077_v39 = vld [vmem:[#allocation5 + $0x1d4] ss:$8 sps:$4 sm:$0xff]  }
  0x6e   :  { %434 = vmatprep.subr.bf16.mxu0 %v1052_v40  ;;  %v80_v40 = vrot.slane %v1261_v45, %v79_v16 }
  0x71   :  { %435 = vmatpush1.bf16.msra.mxu0 %v1050_v41 }
  0x72   :  { %436 = vmatprep.subr.bf16.mxu0 %v1055_v54 }
  0x75   :  { %437 = vmatpush1.bf16.msra.mxu0 %v1053_v55 }
  0x76   :  { %951 = vmatprep.subr.bf16.mxu0 %v1184_v1 }
 0x12b   :  { %v197_v47 = vpop.f32.mrb[0].mxu0 }
 0x12c   :  { %v198_v48 = vadd.f32 %v197_v47, %v76_v46  ;;  %v1266_v49 = vpop.f32.mrb[1].mxu0 }
 0x12d   :  { %v201_v50 = vpop.f32.mrb[2].mxu0  ;;  %v200_v41 = vadd.f32 %v1266_v49, %v80_v40 }
 0x12e   :  { %v204_v51 = vmax.f32 %v198_v48, 0.0  ;;  %v202_v52 = vpop.f32.mrb[3].mxu0 }
 0x12f   :  { %v1079_v52 = vld [vmem:[#allocation5 + $0x1f4] ss:$8 sps:$4 sm:$0xff]  }
 0x130   :  { %v205_v53 = vpack.c.bf16 %v204_v51, %v204_v51  ;;  %v1078_v51 = vld [vmem:[#allocation5 + $0x1e4] ss:$8 sps:$4 sm:$0xff]  }
 0x132   :  { %928 = vmatmul.mubr.bf16.vlgmr.msra.gmra.mrb[0].mxu1 %v205_v53  ;;  %v593_v53 = vld [vmem:[#allocation7 + $0x9] ss:$0 sm:$0xff] }
 0x133   :  { %947 = vmatprep.mubr.msk.bf16.mxu1 %vm1185_vm0, %v1184_v1  ;;  %932 = vmatpush3.bf16.msra.mxu1 %v1056_v56 }
 0x134   :  { %933 = vmatprep.subr.bf16.mxu1 %v1184_v1 }
 0x137   :  { %934 = vmatpush3.bf16.msra.mxu1 %v1057_v2  ;;  %v789_v2 = vld [vmem:[#allocation7 + $0x4] ss:$0 sm:$0xff] }
 0x138   :  { %935 = vmatprep.subr.bf16.mxu1 %v1184_v1 }
 0x13b   :  { %936 = vmatpush3.bf16.msra.mxu1 %v1058_v3 }
 0x13c   :  { %937 = vmatprep.subr.bf16.mxu1 %v1184_v1 }
 0x13f   :  { %938 = vmatpush3.bf16.msra.mxu1 %v1059_v4 }
 0x140   :  { %939 = vmatprep.subr.bf16.mxu1 %v1184_v1 }
 0x143   :  { %940 = vmatpush3.bf16.msra.mxu1 %v1060_v5 }
 0x144   :  { %941 = vmatprep.subr.bf16.mxu1 %v1184_v1 }
 0x147   :  { %942 = vmatpush3.bf16.msra.mxu1 %v1061_v6 }
 0x148   :  { %943 = vmatprep.subr.bf16.mxu1 %v1184_v1 }
 0x14b   :  { %944 = vmatpush3.bf16.msra.mxu1 %v1062_v7 }
 0x14c   :  { %945 = vmatprep.subr.bf16.mxu1 %v1184_v1 }
 0x14f   :  { %946 = vmatpush3.bf16.msra.mxu1 %v1063_v8 }
 0x150   :  { %971 = vmatprep.subr.bf16.mxu1 %v1184_v1 }
 0x205   :  { %v305_v58 = vpop.f32.mrb[0].mxu1 }
 0x206   :  { %v306_v59 = vadd.f32 %v305_v58, %v222_v57  ;;  %v929_v60 = vpop.f32.mrb[1].mxu1 }
 0x207   :  { %v308_v61 = vpop.f32.mrb[2].mxu1 }
 0x208   :  { %v311_v62 = vmax.f32 %v306_v59, 0.0  ;;  %v930_v63 = vpop.f32.mrb[3].mxu1  ;;  %v700_v59 = vld [vmem:[#allocation7 + $0x3] ss:$0 sm:$0xff] }
 0x20a   :  { %v312_v0 = vpack.c.bf16 %v311_v62, %v311_v62 }
 0x20c   :  { %455 = vmatmul.mubr.bf16.vlgmr.msra.gmra.mrb[4].mxu0 %v312_v0 }
 0x20d   :  { %967 = vmatprep.mubr.msk.bf16.mxu0 %vm1185_vm0, %v1184_v1  ;;  %952 = vmatpush3.bf16.msra.mxu0 %v1064_v9 }
 0x20e   :  { %953 = vmatprep.subr.bf16.mxu0 %v1184_v1 }
 0x211   :  { %954 = vmatpush3.bf16.msra.mxu0 %v1065_v10 }
 0x212   :  { %955 = vmatprep.subr.bf16.mxu0 %v1184_v1 }
 0x215   :  { %956 = vmatpush3.bf16.msra.mxu0 %v1066_v11 }
 0x216   :  { %957 = vmatprep.subr.bf16.mxu0 %v1184_v1 }
 0x219   :  { %958 = vmatpush3.bf16.msra.mxu0 %v1067_v12 }
 0x21a   :  { %959 = vmatprep.subr.bf16.mxu0 %v1184_v1 }
 0x21d   :  { %960 = vmatpush3.bf16.msra.mxu0 %v1068_v13 }
 0x21e   :  { %961 = vmatprep.subr.bf16.mxu0 %v1184_v1 }
 0x221   :  { %962 = vmatpush3.bf16.msra.mxu0 %v1069_v14 }
 0x222   :  { %963 = vmatprep.subr.bf16.mxu0 %v1184_v1 }
 0x225   :  { %964 = vmatpush3.bf16.msra.mxu0 %v1070_v33 }
 0x226   :  { %965 = vmatprep.subr.bf16.mxu0 %v1184_v1 }
 0x229   :  { %966 = vmatpush3.bf16.msra.mxu0 %v1071_v34 }
 0x2df   :  { %v456_v19 = vpop.f32.mrb[4].mxu0 }
 0x2e0   :  { %v457_v20 = vadd.f32 %v456_v19, %v335_v17  ;;  %v458_v21 = vpop.f32.mrb[5].mxu0 }
 0x2e1   :  { %v459_v22 = vadd.f32 %v458_v21, %v339_v18  ;;  %v460_v24 = vpop.f32.mrb[6].mxu0 }
 0x2e2   :  { %793 = vst [vmem:[#allocation8 + $0x8] sm:$0xff] %v457_v20  ;;  %v461_v25 = vpop.f32.mrb[7].mxu0 }
 0x2e3   :  { %v463_v26 = vmax.f32 %v459_v22, -4.0 }
 0x2e5   :  { %v464_v27 = vmin.f32 %v463_v26, 15.0 }
 0x2e7   :  { %v465_v28 = vmul.f32 1.442695, %v464_v27 }
 0x2e9   :  { %1080 = vpow2.f32 %v465_v28 }
 0x2f3   :  { %v1081_v29 = vpop.eup %1080 }
 0x2f4   :  { %794 = vst [vmem:[#allocation8 + $0x10] sm:$0xff] %v1081_v29  ;;  %v467_v30 = vmul.f32 %v1081_v29, %v1247_v23  ;;  %v1075_v23 = vld [vmem:[#allocation5 + $0x1b4] ss:$8 sps:$4 sm:$0xff]  }
 0x2f6   :  { %v468_v31 = vadd.f32 %v467_v30, %v457_v20 }
 0x2f8   :  { %v469_v32 = vpack.c.bf16 %v468_v31, %v468_v31 }
 0x2fa   :  { %948 = vmatmul.mubr.bf16.vlgmr.msra.gmra.mrb[4].mxu1 %v469_v32 }
 0x2fb   :  { %987 = vmatprep.mubr.msk.bf16.mxu1 %vm1185_vm0, %v1184_v1  ;;  %972 = vmatpush3.bf16.msra.mxu1 %v1072_v35 }
 0x2fc   :  { %973 = vmatprep.subr.bf16.mxu1 %v1184_v1 }
 0x2ff   :  { %974 = vmatpush3.bf16.msra.mxu1 %v1073_v36 }
 0x300   :  { %975 = vmatprep.subr.bf16.mxu1 %v1184_v1 }
 0x303   :  { %976 = vmatpush3.bf16.msra.mxu1 %v1074_v37 }
 0x304   :  { %977 = vmatprep.subr.bf16.mxu1 %v1184_v1 }
 0x307   :  { %978 = vmatpush3.bf16.msra.mxu1 %v1075_v23 }
 0x308   :  { %979 = vmatprep.subr.bf16.mxu1 %v1184_v1 }
 0x30b   :  { %980 = vmatpush3.bf16.msra.mxu1 %v1076_v38 }
 0x30c   :  { %981 = vmatprep.subr.bf16.mxu1 %v1184_v1 }
 0x30f   :  { %982 = vmatpush3.bf16.msra.mxu1 %v1077_v39 }
 0x310   :  { %983 = vmatprep.subr.bf16.mxu1 %v1184_v1 }
 0x313   :  { %984 = vmatpush3.bf16.msra.mxu1 %v1078_v51 }
 0x314   :  { %985 = vmatprep.subr.bf16.mxu1 %v1184_v1 }
 0x317   :  { %986 = vmatpush3.bf16.msra.mxu1 %v1079_v52 }
 0x3cd   :  { %v568_v42 = vpop.f32.mrb[4].mxu1 }
 0x3ce   :  { %v574_v43 = vadd.f32 %v568_v42, %v200_v41  ;;  %v949_v44 = vpop.f32.mrb[5].mxu1 }
 0x3cf   :  { %v571_v46 = vpop.f32.mrb[6].mxu1 }
 0x3d0   :  { %v575_v47 = vmax.f32 %v574_v43, 0.0  ;;  %v950_v48 = vpop.f32.mrb[7].mxu1 }
 0x3d2   :  { %v576_v50 = vpack.c.bf16 %v575_v47, %v575_v47 }
 0x3d4   :  { %968 = vmatmul.mubr.bf16.vlgmr.msra.gmra.mrb[8].mxu0 %v576_v50 }
 0x4a7   :  { %v676_v54 = vpop.f32.mrb[8].mxu0 }
 0x4a8   :  { %v677_v55 = vadd.f32 %v676_v54, %v593_v53  ;;  %v969_v45 = vpop.f32.mrb[9].mxu0 }
 0x4a9   :  { %v679_v56 = vpop.f32.mrb[10].mxu0 }
 0x4aa   :  { %v682_v49 = vmax.f32 %v677_v55, 0.0  ;;  %v970_v57 = vpop.f32.mrb[11].mxu0 }
 0x4ac   :  { %v683_v58 = vpack.c.bf16 %v682_v49, %v682_v49 }
 0x4ae   :  { %988 = vmatmul.mubr.bf16.vlgmr.msra.gmra.mrb[8].mxu1 %v683_v58 }
 0x581   :  { %v783_v60 = vpop.f32.mrb[8].mxu1 }
 0x582   :  { %v784_v61 = vadd.f32 %v783_v60, %v700_v59  ;;  %v989_v62 = vpop.f32.mrb[9].mxu1 }
 0x583   :  { %v786_v63 = vpop.f32.mrb[10].mxu1 }
 0x584   :  { %1082 = vtanh.f32 %v784_v61  ;;  %v990_v0 = vpop.f32.mrb[11].mxu1 }
 0x58e   :  { %v1083_v1 = vpop.eup %1082 }
 0x58f   :  { %v791_v3 = vmul.f32 %v1083_v1, %v789_v2 }
 0x591   :  { %792 = vst [vmem:[#allocation8] sm:$0xff] %v791_v3 }
 0x592   :  { %1161 = shalt.err (!%p1158_p0)
}
 0x593   :  { %s1162_s25 = scalar_lea.hbm %s1318_s3, 384 }
 0x594   :  { %p1163_p1 = scmp.ne.s32.totalorder %s1318_s3, %s1162_s25  ;;  %p1166_p2 = scmp.lt.u32.totalorder %s1162_s25, %s1318_s3 }
 0x596   :  { %p1168_p3 = pnand %p1166_p2, %p1163_p1 }
 0x598   :  { %1171 = shalt.err (!%p1168_p3)
}
 0x599   :  { %804 = dma.vmem_to_hbm [thread:$0]  %s802_s21, 384, %s1318_s3, [#allocation4]  }
 0x59a   :  { %1176 = dma.done.wait [#allocation4], 384  }
 0x59b   :  { %1177 = vsyncadd [#allocation4], 4294966912 }
 0x59c   :  { %808 = vsyncpa [#allocation3], 1 }
 0x59d   :  { %809 = vsyncpa [#allocation6], 1 }
 0x59e   :  { %810 = vsyncpa [#allocation4], 1 }

</bundles_post_ra>
